<compile_context>
chip_gen: v7x
topology: tpu7x:2x2x1
jax: 0.10.0
libtpu: 0.0.40
codegen_flags: <defaults>
</compile_context>

<pallas_src>
import functools
import math

import jax
import jax.numpy as jnp
from jax import lax
from jax.experimental import pallas as pl
from jax.experimental.pallas import tpu as pltpu


# ---------------------------------------------------------------------------
# VMEM budgeting (per generation: v5e/v6e = 128 MiB, v7x = 64 MiB per TensorCore)
# ---------------------------------------------------------------------------
def _vmem_limit_bytes(frac=0.7, cap=100 * 1024 * 1024, fallback=48 * 1024 * 1024):
    try:
        vmem = pltpu.get_tpu_info().vmem_capacity_bytes
        return int(max(32 * 1024 * 1024, min(cap, frac * vmem)))
    except Exception:
        return fallback


def _pick_block_m(M, in_cols, out_cols, limit):
    """Largest M-tile whose double-buffered bf16 in/out blocks (+ resident weights) fit."""
    w_bytes = 2 * 2 * in_cols * out_cols                  # double-buffered bf16 weight block
    avail = max(limit // 2 - w_bytes, 2 * 1024 * 1024)    # headroom for scratch / regalloc
    row_bytes = 2 * 2 * (in_cols + out_cols)              # x row + out row, x2 buffers, bf16
    tm = min(max(avail // row_bytes, 8), 2048, M)
    if tm < M:
        tm = max((tm // 8) * 8, 8)                        # keep sublane (8) alignment
    return int(tm)


# ---------------------------------------------------------------------------
# Kernel 1a: fused q/k/v projection for true self-attention (x DMA'd once, one wide matmul)
# ---------------------------------------------------------------------------
def _fused_qkv_proj_kernel(x_ref, w_ref, b_ref, oq_ref, ok_ref, ov_ref, *, out_dim):
    # x_ref: (tm, Din) bf16; w_ref: (Din, 3*out_dim) bf16; b_ref: (1, 3*out_dim) f32
    y = jnp.dot(x_ref[...], w_ref[...], preferred_element_type=jnp.float32) + b_ref[...]
    oq_ref[...] = y[:, :out_dim].astype(oq_ref.dtype)
    ok_ref[...] = y[:, out_dim:2 * out_dim].astype(ok_ref.dtype)
    ov_ref[...] = y[:, 2 * out_dim:].astype(ov_ref.dtype)


def qkv_projection_fused(x2d, w_cat, b_cat, *, out_dim, out_dtype=jnp.bfloat16):
    """x2d: (M, Din) bf16 (q = k = v); w_cat: (Din, 3*out_dim) bf16; b_cat: (1, 3*out_dim) f32
       -> (qw, kw, vw), each (M, out_dim) bf16, computed in a single launch."""
    M, Din = x2d.shape
    limit = _vmem_limit_bytes()
    tm = _pick_block_m(M, Din, 3 * out_dim, limit)
    o_struct = jax.ShapeDtypeStruct((M, out_dim), out_dtype)
    o_spec = pl.BlockSpec((tm, out_dim), lambda i: (i, 0))
    return pl.pallas_call(
        functools.partial(_fused_qkv_proj_kernel, out_dim=out_dim),
        out_shape=(o_struct, o_struct, o_struct),
        grid=(pl.cdiv(M, tm),),
        in_specs=[pl.BlockSpec((tm, Din), lambda i: (i, 0)),
                  pl.BlockSpec((Din, 3 * out_dim), lambda i: (0, 0)),    # constant block
                  pl.BlockSpec((1, 3 * out_dim), lambda i: (0, 0))],     # constant block
        out_specs=(o_spec, o_spec, o_spec),
        compiler_params=pltpu.CompilerParams(
            dimension_semantics=("parallel",),
            vmem_limit_bytes=limit),
    )(x2d, w_cat, b_cat)


# ---------------------------------------------------------------------------
# Kernel 1b: general q/k/v projection (distinct q/k/v inputs, same M)
# ---------------------------------------------------------------------------
def _qkv_proj_kernel(xq_ref, xk_ref, xv_ref, w_ref, b_ref, oq_ref, ok_ref, ov_ref):
    def proj(x_ref, s, o_ref):
        y = jnp.dot(x_ref[...], w_ref[s], preferred_element_type=jnp.float32) + b_ref[s]
        o_ref[...] = y.astype(o_ref.dtype)
    proj(xq_ref, 0, oq_ref)
    proj(xk_ref, 1, ok_ref)
    proj(xv_ref, 2, ov_ref)


def qkv_projection(q2d, k2d, v2d, w_stack, b_stack, *, out_dim, out_dtype=jnp.bfloat16):
    """q2d/k2d/v2d: (M, Din) bf16; w_stack: (3, Din, out_dim) bf16; b_stack: (3, 1, out_dim) f32."""
    M, Din = q2d.shape
    limit = _vmem_limit_bytes()
    tm = _pick_block_m(M, 3 * Din, 3 * out_dim, limit)
    x_spec = pl.BlockSpec((tm, Din), lambda i: (i, 0))
    o_struct = jax.ShapeDtypeStruct((M, out_dim), out_dtype)
    o_spec = pl.BlockSpec((tm, out_dim), lambda i: (i, 0))
    return pl.pallas_call(
        _qkv_proj_kernel,
        out_shape=(o_struct, o_struct, o_struct),
        grid=(pl.cdiv(M, tm),),
        in_specs=[x_spec, x_spec, x_spec,
                  pl.BlockSpec((3, Din, out_dim), lambda i: (0, 0, 0)),  # constant block
                  pl.BlockSpec((3, 1, out_dim), lambda i: (0, 0, 0))],   # constant block
        out_specs=(o_spec, o_spec, o_spec),
        compiler_params=pltpu.CompilerParams(
            dimension_semantics=("parallel",),
            vmem_limit_bytes=limit),
    )(q2d, k2d, v2d, w_stack, b_stack)


# ---------------------------------------------------------------------------
# Kernel 2: multi-head attention, grid = (batch, query tiles), all heads per step
# ---------------------------------------------------------------------------
def _mha_kernel(q_ref, k_ref, v_ref, vmask_ref, qmask_ref, o_ref, *,
                nb_head, size_per_head, scale):
    # q_ref: (tq, H*dh) bf16; k_ref/v_ref: (Sk, H*dh) bf16
    # vmask_ref: (1, Sk) f32; qmask_ref: (tq, 1) f32; o_ref: (tq, H*dh)
    neg = (1.0 - vmask_ref[...]) * 1e10            # key-axis 'add' mask (hoisted)
    qmask = qmask_ref[...]                         # query 'mul' mask (hoisted)
    # TODO(synk): for very long Sk, tile the KV axis flash-style (online softmax with VMEM
    # scratch); for large nb_head, move heads onto a grid axis with a (B, H, S, dh) layout.
    for h in range(nb_head):                       # static unroll (small H); each iteration
        sl = slice(h * size_per_head, (h + 1) * size_per_head)   # ends in a store, bounding
        qh = q_ref[:, sl]                          # its live ranges.  Ref-level per-head
        kh = k_ref[:, sl]                          # loads: only (tq, dh)/(Sk, dh) tiles live.
        vh = v_ref[:, sl]
        scores = lax.dot_general(                  # qh @ kh^T without materializing k.T
            qh, kh, (((1,), (1,)), ((), ())),
            preferred_element_type=jnp.float32) * scale          # (tq, Sk) f32
        scores = scores - neg                                    # additive key mask
        scores = scores - jnp.max(scores, axis=-1, keepdims=True)
        p = jnp.exp(scores)
        p = p * pl.reciprocal(jnp.sum(p, axis=-1, keepdims=True), approx=True)
        oh = jnp.dot(p.astype(vh.dtype), vh,
                     preferred_element_type=jnp.float32)         # (tq, dh) f32
        o_ref[:, sl] = (oh * qmask).astype(o_ref.dtype)          # direct per-head store


def attention(qw, kw, vw, v_mask, q_mask, *, nb_head, size_per_head, out_dtype):
    """qw: (B, Sq, D); kw/vw: (B, Sk, D); v_mask: (B, Sk); q_mask: (B, Sq) -> (B, Sq, D)."""
    B, Sq, D = qw.shape
    Sk = kw.shape[1]
    tq = Sq if Sq <= 256 else 256                  # query tiling caps scores at (tq, Sk) f32
    limit = _vmem_limit_bytes()
    kernel = functools.partial(_mha_kernel, nb_head=nb_head, size_per_head=size_per_head,
                               scale=1.0 / math.sqrt(size_per_head))
    return pl.pallas_call(
        kernel,
        out_shape=jax.ShapeDtypeStruct((B, Sq, D), out_dtype),
        grid=(B, pl.cdiv(Sq, tq)),
        in_specs=[pl.BlockSpec((None, tq, D), lambda b, i: (b, i, 0)),
                  pl.BlockSpec((None, Sk, D), lambda b, i: (b, 0, 0)),
                  pl.BlockSpec((None, Sk, D), lambda b, i: (b, 0, 0)),
                  pl.BlockSpec((None, 1, Sk), lambda b, i: (b, 0, 0)),
                  pl.BlockSpec((None, tq, 1), lambda b, i: (b, i, 0))],
        out_specs=pl.BlockSpec((None, tq, D), lambda b, i: (b, i, 0)),
        compiler_params=pltpu.CompilerParams(
            dimension_semantics=("parallel", "parallel"),   # batch & query tiles -> megacore
            vmem_limit_bytes=limit),
    )(qw, kw, vw,
      v_mask.reshape(B, 1, Sk).astype(jnp.float32),
      q_mask.reshape(B, Sq, 1).astype(jnp.float32))


# ---------------------------------------------------------------------------
# Forward wrappers (weight prep happens ONCE, outside the per-call jit)
# ---------------------------------------------------------------------------
def prepare_params(params, dtype=jnp.bfloat16):
    """One-time transpose / stack / bf16 cast of the q/k/v projection weights."""
    wq_t, wk_t, wv_t = params["wq"].T, params["wk"].T, params["wv"].T    # (Din, out_dim)
    biases = [params["bq"], params["bk"], params["bv"]]
    return {
        "w_cat": jnp.concatenate([wq_t, wk_t, wv_t], axis=1).astype(dtype),   # (Din, 3*out)
        "b_cat": jnp.concatenate(biases)[None, :].astype(jnp.float32),        # (1, 3*out)
        "w_stack": jnp.stack([wq_t, wk_t, wv_t]).astype(dtype),               # (3, Din, out)
        "b_stack": jnp.stack(biases)[:, None, :].astype(jnp.float32),         # (3, 1, out)
    }


def self_attention_forward(prepared, x, v_mask, q_mask, nb_head, size_per_head):
    """Fast path for true self-attention (q = k = v = x): x is DMA'd once per tile and
    projected with one wide matmul.  (Dispatch on `q is k is v` must happen outside jit.)"""
    B, S, Din = x.shape
    out_dim = nb_head * size_per_head
    x2d = x.reshape(B * S, Din).astype(jnp.bfloat16)       # bf16 activations: half the DMA
    qw, kw, vw = qkv_projection_fused(x2d, prepared["w_cat"], prepared["b_cat"],
                                      out_dim=out_dim)
    if v_mask is None:
        v_mask = jnp.ones((B, S), jnp.float32)
    if q_mask is None:
        q_mask = jnp.ones((B, S), jnp.float32)
    return attention(qw.reshape(B, S, out_dim), kw.reshape(B, S, out_dim),
                     vw.reshape(B, S, out_dim), v_mask, q_mask,
                     nb_head=nb_head, size_per_head=size_per_head, out_dtype=x.dtype)


def mha_forward(prepared, q, k, v, v_mask, q_mask, nb_head, size_per_head):
    """General path matching SelfAttention.forward for distinct q/k/v (same seq length)."""
    B, Sq, Din = q.shape
    Sk = k.shape[1]
    out_dim = nb_head * size_per_head
    # TODO(synk): cross-length attention (Sq != Sk) needs a separate projection launch for q.
    assert Sq == Sk, "single-launch q/k/v projection requires Sq == Sk"
    # TODO(synk): on v5e (lowest HBM BW) fuse the projection into the attention kernel to
    # avoid the stacked-QKV HBM round trip entirely.
    to2d = lambda t: t.reshape(-1, t.shape[-1]).astype(jnp.bfloat16)
    qw, kw, vw = qkv_projection(to2d(q), to2d(k), to2d(v),
                                prepared["w_stack"], prepared["b_stack"], out_dim=out_dim)
    if v_mask is None:
        v_mask = jnp.ones((B, Sk), jnp.float32)
    if q_mask is None:
        q_mask = jnp.ones((B, Sq), jnp.float32)
    return attention(qw.reshape(B, Sq, out_dim), kw.reshape(B, Sk, out_dim),
                     vw.reshape(B, Sk, out_dim), v_mask, q_mask,
                     nb_head=nb_head, size_per_head=size_per_head, out_dtype=q.dtype)


# ---------------------------------------------------------------------------
# Pure-JAX f32 reference (correctness sanity check, mirrors the PyTorch module)
# ---------------------------------------------------------------------------
def _reference(params, q, k, v, v_mask, q_mask, nb_head, size_per_head):
    B, Sq, _ = q.shape
    Sk = k.shape[1]
    out_dim = nb_head * size_per_head
    qw1 = q @ params["wq"].T + params["bq"]
    kw1 = k @ params["wk"].T + params["bk"]
    vw1 = v @ params["wv"].T + params["bv"]
    qw = qw1.reshape(B, Sq, nb_head, size_per_head).transpose(0, 2, 1, 3)
    kw = kw1.reshape(B, Sk, nb_head, size_per_head).transpose(0, 2, 1, 3)
    vw = vw1.reshape(B, Sk, nb_head, size_per_head).transpose(0, 2, 1, 3)
    a = jnp.einsum("bhqd,bhkd->bhqk", qw, kw) / math.sqrt(size_per_head)
    a = a - (1.0 - v_mask)[:, None, None, :] * 1e10
    a = jax.nn.softmax(a, axis=-1)
    o = jnp.einsum("bhqk,bhkd->bhqd", a, vw).transpose(0, 2, 1, 3).reshape(B, Sq, out_dim)
    return o * q_mask[:, :, None]


if __name__ == "__main__":
    nb_head, size_per_head, input_size = 4, 8, 32
    B, S = 2, 8
    out_dim = nb_head * size_per_head

    key = jax.random.PRNGKey(0)
    keys = jax.random.split(key, 9)

    # Deterministic parameter init (nn.Linear: weight (out_dim, in_dim), bias (out_dim,))
    sc = 1.0 / math.sqrt(input_size)
    params = {
        "wq": jax.random.uniform(keys[0], (out_dim, input_size), jnp.float32, -sc, sc),
        "bq": jax.random.uniform(keys[1], (out_dim,), jnp.float32, -sc, sc),
        "wk": jax.random.uniform(keys[2], (out_dim, input_size), jnp.float32, -sc, sc),
        "bk": jax.random.uniform(keys[3], (out_dim,), jnp.float32, -sc, sc),
        "wv": jax.random.uniform(keys[4], (out_dim, input_size), jnp.float32, -sc, sc),
        "bv": jax.random.uniform(keys[5], (out_dim,), jnp.float32, -sc, sc),
    }

    q = jax.random.normal(keys[6], (B, S, input_size), jnp.float32)
    k = jax.random.normal(keys[7], (B, S, input_size), jnp.float32)
    v = jax.random.normal(keys[8], (B, S, input_size), jnp.float32)

    # float masks (1 = keep, 0 = masked); keep at least one valid position per row
    v_mask = jnp.concatenate(
        [jnp.ones((B, S - 2), jnp.float32), jnp.zeros((B, 2), jnp.float32)], axis=1)
    q_mask = jnp.concatenate(
        [jnp.ones((B, S - 1), jnp.float32), jnp.zeros((B, 1), jnp.float32)], axis=1)

    prepared = prepare_params(params)   # one-time weight transpose/stack/bf16 cast

    fwd_general = jax.jit(functools.partial(
        mha_forward, nb_head=nb_head, size_per_head=size_per_head))
    fwd_self = jax.jit(functools.partial(
        self_attention_forward, nb_head=nb_head, size_per_head=size_per_head))

    out_general = jax.block_until_ready(fwd_general(prepared, q, k, v, v_mask, q_mask))
    out_self = jax.block_until_ready(fwd_self(prepared, q, v_mask, q_mask))

    ref_general = _reference(params, q, k, v, v_mask, q_mask, nb_head, size_per_head)
    ref_self = _reference(params, q, q, q, v_mask, q_mask, nb_head, size_per_head)

    assert out_general.shape == (B, S, out_dim)
    assert out_self.shape == (B, S, out_dim)
    # bf16 MXU matmuls + bf16 q/k/v activations (and approx EUP reciprocal) vs f32 reference
    assert jnp.allclose(out_general, ref_general, atol=2e-2, rtol=2e-2), "general path mismatch"
    assert jnp.allclose(out_self, ref_self, atol=2e-2, rtol=2e-2), "fused self path mismatch"

    print("KERNEL_OK")
</pallas_src>

<mosaic_0001>
module attributes {stable_mosaic.version = 11 : i64} {
  func.func @_qkv_proj_kernel(%arg0: i32, %arg1: memref<16x32xbf16, #tpu.memory_space<vmem>>, %arg2: memref<16x32xbf16, #tpu.memory_space<vmem>>, %arg3: memref<16x32xbf16, #tpu.memory_space<vmem>>, %arg4: memref<3x32x32xbf16, #tpu.memory_space<vmem>>, %arg5: memref<3x1x32xf32, #tpu.memory_space<vmem>>, %arg6: memref<16x32xbf16, #tpu.memory_space<vmem>>, %arg7: memref<16x32xbf16, #tpu.memory_space<vmem>>, %arg8: memref<16x32xbf16, #tpu.memory_space<vmem>>) attributes {dimension_semantics = [#tpu.dimension_semantics<parallel>], iteration_bounds = array<i64: 1>, scalar_prefetch = 0 : i64, scratch_operands = 0 : i64, tpu.core_type = #tpu.core_type<tc>, window_params = [{transform_indices = @transform_0, window_bounds = array<i64: 16, 32>}, {transform_indices = @transform_1, window_bounds = array<i64: 16, 32>}, {transform_indices = @transform_2, window_bounds = array<i64: 16, 32>}, {pipeline_mode = #tpu.pipeline_mode<synchronous>, transform_indices = @transform_3, window_bounds = array<i64: 3, 32, 32>}, {pipeline_mode = #tpu.pipeline_mode<synchronous>, transform_indices = @transform_4, window_bounds = array<i64: 3, 1, 32>}, {transform_indices = @transform_5, window_bounds = array<i64: 16, 32>}, {transform_indices = @transform_6, window_bounds = array<i64: 16, 32>}, {transform_indices = @transform_7, window_bounds = array<i64: 16, 32>}]} {
    %c0 = arith.constant 0 : index
    %c0_0 = arith.constant 0 : index
    %0 = vector.load %arg1[%c0, %c0_0] : memref<16x32xbf16, #tpu.memory_space<vmem>>, vector<16x32xbf16>
    %c0_1 = arith.constant 0 : index
    %c0_2 = arith.constant 0 : index
    %c0_3 = arith.constant 0 : index
    %1 = vector.load %arg4[%c0_1, %c0_2, %c0_3] : memref<3x32x32xbf16, #tpu.memory_space<vmem>>, vector<1x32x32xbf16>
    %2 = vector.shape_cast %1 : vector<1x32x32xbf16> to vector<32x32xbf16>
    %cst = arith.constant dense<0.000000e+00> : vector<16x32xf32>
    %3 = tpu.matmul %0, %2, %cst {dimension_numbers = #tpu.dot_dimension_numbers<[1], [0], [0], [1], [0, 0, 1, 1], [], []>} : vector<16x32xbf16>, vector<32x32xbf16>, vector<16x32xf32> -> vector<16x32xf32>
    %c0_4 = arith.constant 0 : index
    %c0_5 = arith.constant 0 : index
    %c0_6 = arith.constant 0 : index
    %4 = vector.load %arg5[%c0_4, %c0_5, %c0_6] : memref<3x1x32xf32, #tpu.memory_space<vmem>>, vector<1x1x32xf32>
    %5 = vector.shape_cast %4 : vector<1x1x32xf32> to vector<1x32xf32>
    %6 = vector.broadcast %5 : vector<1x32xf32> to vector<16x32xf32>
    %7 = arith.addf %3, %6 : vector<16x32xf32>
    %8 = arith.truncf %7 : vector<16x32xf32> to vector<16x32xbf16>
    %c0_7 = arith.constant 0 : index
    %c0_8 = arith.constant 0 : index
    %9 = vector.load %arg6[%c0_7, %c0_8] : memref<16x32xbf16, #tpu.memory_space<vmem>>, vector<16x32xbf16>
    tpu.vector_store %arg6[%c0_7, %c0_8], %8 {strides = array<i32>} : memref<16x32xbf16, #tpu.memory_space<vmem>>, vector<16x32xbf16>,
    %c0_9 = arith.constant 0 : index
    %c0_10 = arith.constant 0 : index
    %10 = vector.load %arg2[%c0_9, %c0_10] : memref<16x32xbf16, #tpu.memory_space<vmem>>, vector<16x32xbf16>
    %c1 = arith.constant 1 : index
    %c0_11 = arith.constant 0 : index
    %c0_12 = arith.constant 0 : index
    %11 = vector.load %arg4[%c1, %c0_11, %c0_12] : memref<3x32x32xbf16, #tpu.memory_space<vmem>>, vector<1x32x32xbf16>
    %12 = vector.shape_cast %11 : vector<1x32x32xbf16> to vector<32x32xbf16>
    %cst_13 = arith.constant dense<0.000000e+00> : vector<16x32xf32>
    %13 = tpu.matmul %10, %12, %cst_13 {dimension_numbers = #tpu.dot_dimension_numbers<[1], [0], [0], [1], [0, 0, 1, 1], [], []>} : vector<16x32xbf16>, vector<32x32xbf16>, vector<16x32xf32> -> vector<16x32xf32>
    %c1_14 = arith.constant 1 : index
    %c0_15 = arith.constant 0 : index
    %c0_16 = arith.constant 0 : index
    %14 = vector.load %arg5[%c1_14, %c0_15, %c0_16] : memref<3x1x32xf32, #tpu.memory_space<vmem>>, vector<1x1x32xf32>
    %15 = vector.shape_cast %14 : vector<1x1x32xf32> to vector<1x32xf32>
    %16 = vector.broadcast %15 : vector<1x32xf32> to vector<16x32xf32>
    %17 = arith.addf %13, %16 : vector<16x32xf32>
    %18 = arith.truncf %17 : vector<16x32xf32> to vector<16x32xbf16>
    %c0_17 = arith.constant 0 : index
    %c0_18 = arith.constant 0 : index
    %19 = vector.load %arg7[%c0_17, %c0_18] : memref<16x32xbf16, #tpu.memory_space<vmem>>, vector<16x32xbf16>
    tpu.vector_store %arg7[%c0_17, %c0_18], %18 {strides = array<i32>} : memref<16x32xbf16, #tpu.memory_space<vmem>>, vector<16x32xbf16>,
    %c0_19 = arith.constant 0 : index
    %c0_20 = arith.constant 0 : index
    %20 = vector.load %arg3[%c0_19, %c0_20] : memref<16x32xbf16, #tpu.memory_space<vmem>>, vector<16x32xbf16>
    %c2 = arith.constant 2 : index
    %c0_21 = arith.constant 0 : index
    %c0_22 = arith.constant 0 : index
    %21 = vector.load %arg4[%c2, %c0_21, %c0_22] : memref<3x32x32xbf16, #tpu.memory_space<vmem>>, vector<1x32x32xbf16>
    %22 = vector.shape_cast %21 : vector<1x32x32xbf16> to vector<32x32xbf16>
    %cst_23 = arith.constant dense<0.000000e+00> : vector<16x32xf32>
    %23 = tpu.matmul %20, %22, %cst_23 {dimension_numbers = #tpu.dot_dimension_numbers<[1], [0], [0], [1], [0, 0, 1, 1], [], []>} : vector<16x32xbf16>, vector<32x32xbf16>, vector<16x32xf32> -> vector<16x32xf32>
    %c2_24 = arith.constant 2 : index
    %c0_25 = arith.constant 0 : index
    %c0_26 = arith.constant 0 : index
    %24 = vector.load %arg5[%c2_24, %c0_25, %c0_26] : memref<3x1x32xf32, #tpu.memory_space<vmem>>, vector<1x1x32xf32>
    %25 = vector.shape_cast %24 : vector<1x1x32xf32> to vector<1x32xf32>
    %26 = vector.broadcast %25 : vector<1x32xf32> to vector<16x32xf32>
    %27 = arith.addf %23, %26 : vector<16x32xf32>
    %28 = arith.truncf %27 : vector<16x32xf32> to vector<16x32xbf16>
    %c0_27 = arith.constant 0 : index
    %c0_28 = arith.constant 0 : index
    %29 = vector.load %arg8[%c0_27, %c0_28] : memref<16x32xbf16, #tpu.memory_space<vmem>>, vector<16x32xbf16>
    tpu.vector_store %arg8[%c0_27, %c0_28], %28 {strides = array<i32>} : memref<16x32xbf16, #tpu.memory_space<vmem>>, vector<16x32xbf16>,
    return
  }
  func.func @transform_0(%arg0: i32) -> (i32, i32) {
    %c0_i32 = arith.constant 0 : i32
    %c0_i32_0 = arith.constant 0 : i32
    return %arg0, %c0_i32 : i32, i32
  }
  func.func @transform_1(%arg0: i32) -> (i32, i32) {
    %c0_i32 = arith.constant 0 : i32
    %c0_i32_0 = arith.constant 0 : i32
    return %arg0, %c0_i32 : i32, i32
  }
  func.func @transform_2(%arg0: i32) -> (i32, i32) {
    %c0_i32 = arith.constant 0 : i32
    %c0_i32_0 = arith.constant 0 : i32
    return %arg0, %c0_i32 : i32, i32
  }
  func.func @transform_3(%arg0: i32) -> (i32, i32, i32) {
    %c0_i32 = arith.constant 0 : i32
    %c0_i32_0 = arith.constant 0 : i32
    %c0_i32_1 = arith.constant 0 : i32
    %c0_i32_2 = arith.constant 0 : i32
    return %c0_i32, %c0_i32_0, %c0_i32_1 : i32, i32, i32
  }
  func.func @transform_4(%arg0: i32) -> (i32, i32, i32) {
    %c0_i32 = arith.constant 0 : i32
    %c0_i32_0 = arith.constant 0 : i32
    %c0_i32_1 = arith.constant 0 : i32
    %c0_i32_2 = arith.constant 0 : i32
    return %c0_i32, %c0_i32_0, %c0_i32_1 : i32, i32, i32
  }
  func.func @transform_5(%arg0: i32) -> (i32, i32) {
    %c0_i32 = arith.constant 0 : i32
    %c0_i32_0 = arith.constant 0 : i32
    return %arg0, %c0_i32 : i32, i32
  }
  func.func @transform_6(%arg0: i32) -> (i32, i32) {
    %c0_i32 = arith.constant 0 : i32
    %c0_i32_0 = arith.constant 0 : i32
    return %arg0, %c0_i32 : i32, i32
  }
  func.func @transform_7(%arg0: i32) -> (i32, i32) {
    %c0_i32 = arith.constant 0 : i32
    %c0_i32_0 = arith.constant 0 : i32
    return %arg0, %c0_i32 : i32, i32
  }
}

module attributes {stable_mosaic.version = 11 : i64} {
  func.func @_mha_kernel(%arg0: i32, %arg1: i32, %arg2: memref<1x8x32xbf16, #tpu.memory_space<vmem>>, %arg3: memref<1x8x32xbf16, #tpu.memory_space<vmem>>, %arg4: memref<1x8x32xbf16, #tpu.memory_space<vmem>>, %arg5: memref<1x1x8xf32, #tpu.memory_space<vmem>>, %arg6: memref<1x8x1xf32, #tpu.memory_space<vmem>>, %arg7: memref<1x8x32xf32, #tpu.memory_space<vmem>>) attributes {dimension_semantics = [#tpu.dimension_semantics<parallel>, #tpu.dimension_semantics<parallel>], iteration_bounds = array<i64: 2, 1>, scalar_prefetch = 0 : i64, scratch_operands = 0 : i64, tpu.core_type = #tpu.core_type<tc>, window_params = [{transform_indices = @transform_0, window_bounds = array<i64: 1, 8, 32>}, {transform_indices = @transform_1, window_bounds = array<i64: 1, 8, 32>}, {transform_indices = @transform_2, window_bounds = array<i64: 1, 8, 32>}, {transform_indices = @transform_3, window_bounds = array<i64: 1, 1, 8>}, {transform_indices = @transform_4, window_bounds = array<i64: 1, 8, 1>}, {transform_indices = @transform_5, window_bounds = array<i64: 1, 8, 32>}]} {
    %c0 = arith.constant 0 : index
    %c0_0 = arith.constant 0 : index
    %c0_1 = arith.constant 0 : index
    %0 = vector.load %arg5[%c0, %c0_0, %c0_1] : memref<1x1x8xf32, #tpu.memory_space<vmem>>, vector<1x1x8xf32>
    %1 = vector.shape_cast %0 : vector<1x1x8xf32> to vector<1x8xf32>
    %cst = arith.constant 1.000000e+00 : f32
    %2 = vector.broadcast %cst : f32 to vector<1x8xf32>
    %3 = arith.subf %2, %1 : vector<1x8xf32>
    %cst_2 = arith.constant 1.000000e+10 : f32
    %4 = vector.broadcast %cst_2 : f32 to vector<1x8xf32>
    %5 = arith.mulf %3, %4 : vector<1x8xf32>
    %c0_3 = arith.constant 0 : index
    %c0_4 = arith.constant 0 : index
    %c0_5 = arith.constant 0 : index
    %6 = vector.load %arg6[%c0_3, %c0_4, %c0_5] : memref<1x8x1xf32, #tpu.memory_space<vmem>>, vector<1x8x1xf32>
    %7 = vector.shape_cast %6 : vector<1x8x1xf32> to vector<8x1xf32>
    %c0_6 = arith.constant 0 : index
    %c0_7 = arith.constant 0 : index
    %c0_8 = arith.constant 0 : index
    %8 = vector.load %arg2[%c0_6, %c0_7, %c0_8] : memref<1x8x32xbf16, #tpu.memory_space<vmem>>, vector<1x8x8xbf16>
    %9 = vector.shape_cast %8 : vector<1x8x8xbf16> to vector<8x8xbf16>
    %c0_9 = arith.constant 0 : index
    %c0_10 = arith.constant 0 : index
    %c0_11 = arith.constant 0 : index
    %10 = vector.load %arg3[%c0_9, %c0_10, %c0_11] : memref<1x8x32xbf16, #tpu.memory_space<vmem>>, vector<1x8x8xbf16>
    %11 = vector.shape_cast %10 : vector<1x8x8xbf16> to vector<8x8xbf16>
    %c0_12 = arith.constant 0 : index
    %c0_13 = arith.constant 0 : index
    %c0_14 = arith.constant 0 : index
    %12 = vector.load %arg4[%c0_12, %c0_13, %c0_14] : memref<1x8x32xbf16, #tpu.memory_space<vmem>>, vector<1x8x8xbf16>
    %13 = vector.shape_cast %12 : vector<1x8x8xbf16> to vector<8x8xbf16>
    %cst_15 = arith.constant dense<0.000000e+00> : vector<8x8xf32>
    %14 = tpu.matmul %9, %11, %cst_15 {dimension_numbers = #tpu.dot_dimension_numbers<[1], [1], [0], [0], [0, 0, 1, 0], [], []>} : vector<8x8xbf16>, vector<8x8xbf16>, vector<8x8xf32> -> vector<8x8xf32>
    %cst_16 = arith.constant 0.353553385 : f32
    %15 = vector.broadcast %cst_16 : f32 to vector<8x8xf32>
    %16 = arith.mulf %14, %15 : vector<8x8xf32>
    %17 = vector.broadcast %5 : vector<1x8xf32> to vector<8x8xf32>
    %18 = arith.subf %16, %17 : vector<8x8xf32>
    %cst_17 = arith.constant dense<0xFF800000> : vector<8xf32>
    %19 = vector.multi_reduction <maximumf>, %18, %cst_17 [1] : vector<8x8xf32> to vector<8xf32>
    %20 = vector.shape_cast %19 : vector<8xf32> to vector<8x1xf32>
    %21 = vector.broadcast %20 : vector<8x1xf32> to vector<8x8xf32>
    %22 = arith.subf %18, %21 : vector<8x8xf32>
    %23 = math.exp %22 : vector<8x8xf32>
    %cst_18 = arith.constant dense<0.000000e+00> : vector<8xf32>
    %24 = vector.multi_reduction <add>, %23, %cst_18 [1] : vector<8x8xf32> to vector<8xf32>
    %25 = vector.shape_cast %24 : vector<8xf32> to vector<8x1xf32>
    %26 = tpu.reciprocal %25 {approx = true} : vector<8x1xf32> -> vector<8x1xf32>
    %27 = vector.broadcast %26 : vector<8x1xf32> to vector<8x8xf32>
    %28 = arith.mulf %23, %27 : vector<8x8xf32>
    %29 = arith.truncf %28 : vector<8x8xf32> to vector<8x8xbf16>
    %cst_19 = arith.constant dense<0.000000e+00> : vector<8x8xf32>
    %30 = tpu.matmul %29, %13, %cst_19 {dimension_numbers = #tpu.dot_dimension_numbers<[1], [0], [0], [1], [0, 0, 1, 1], [], []>} : vector<8x8xbf16>, vector<8x8xbf16>, vector<8x8xf32> -> vector<8x8xf32>
    %31 = vector.broadcast %7 : vector<8x1xf32> to vector<8x8xf32>
    %32 = arith.mulf %30, %31 : vector<8x8xf32>
    %c0_20 = arith.constant 0 : index
    %c0_21 = arith.constant 0 : index
    %c0_22 = arith.constant 0 : index
    %33 = vector.load %arg7[%c0_20, %c0_21, %c0_22] : memref<1x8x32xf32, #tpu.memory_space<vmem>>, vector<1x8x8xf32>
    %34 = vector.shape_cast %33 : vector<1x8x8xf32> to vector<8x8xf32>
    %35 = vector.shape_cast %32 : vector<8x8xf32> to vector<1x8x8xf32>
    tpu.vector_store %arg7[%c0_20, %c0_21, %c0_22], %35 {strides = array<i32>} : memref<1x8x32xf32, #tpu.memory_space<vmem>>, vector<1x8x8xf32>,
    %c0_23 = arith.constant 0 : index
    %c0_24 = arith.constant 0 : index
    %c8 = arith.constant 8 : index
    %36 = vector.load %arg2[%c0_23, %c0_24, %c8] : memref<1x8x32xbf16, #tpu.memory_space<vmem>>, vector<1x8x8xbf16>
    %37 = vector.shape_cast %36 : vector<1x8x8xbf16> to vector<8x8xbf16>
    %c0_25 = arith.constant 0 : index
    %c0_26 = arith.constant 0 : index
    %c8_27 = arith.constant 8 : index
    %38 = vector.load %arg3[%c0_25, %c0_26, %c8_27] : memref<1x8x32xbf16, #tpu.memory_space<vmem>>, vector<1x8x8xbf16>
    %39 = vector.shape_cast %38 : vector<1x8x8xbf16> to vector<8x8xbf16>
    %c0_28 = arith.constant 0 : index
    %c0_29 = arith.constant 0 : index
    %c8_30 = arith.constant 8 : index
    %40 = vector.load %arg4[%c0_28, %c0_29, %c8_30] : memref<1x8x32xbf16, #tpu.memory_space<vmem>>, vector<1x8x8xbf16>
    %41 = vector.shape_cast %40 : vector<1x8x8xbf16> to vector<8x8xbf16>
    %cst_31 = arith.constant dense<0.000000e+00> : vector<8x8xf32>
    %42 = tpu.matmul %37, %39, %cst_31 {dimension_numbers = #tpu.dot_dimension_numbers<[1], [1], [0], [0], [0, 0, 1, 0], [], []>} : vector<8x8xbf16>, vector<8x8xbf16>, vector<8x8xf32> -> vector<8x8xf32>
    %cst_32 = arith.constant 0.353553385 : f32
    %43 = vector.broadcast %cst_32 : f32 to vector<8x8xf32>
    %44 = arith.mulf %42, %43 : vector<8x8xf32>
    %45 = vector.broadcast %5 : vector<1x8xf32> to vector<8x8xf32>
    %46 = arith.subf %44, %45 : vector<8x8xf32>
    %cst_33 = arith.constant dense<0xFF800000> : vector<8xf32>
    %47 = vector.multi_reduction <maximumf>, %46, %cst_33 [1] : vector<8x8xf32> to vector<8xf32>
    %48 = vector.shape_cast %47 : vector<8xf32> to vector<8x1xf32>
    %49 = vector.broadcast %48 : vector<8x1xf32> to vector<8x8xf32>
    %50 = arith.subf %46, %49 : vector<8x8xf32>
    %51 = math.exp %50 : vector<8x8xf32>
    %cst_34 = arith.constant dense<0.000000e+00> : vector<8xf32>
    %52 = vector.multi_reduction <add>, %51, %cst_34 [1] : vector<8x8xf32> to vector<8xf32>
    %53 = vector.shape_cast %52 : vector<8xf32> to vector<8x1xf32>
    %54 = tpu.reciprocal %53 {approx = true} : vector<8x1xf32> -> vector<8x1xf32>
    %55 = vector.broadcast %54 : vector<8x1xf32> to vector<8x8xf32>
    %56 = arith.mulf %51, %55 : vector<8x8xf32>
    %57 = arith.truncf %56 : vector<8x8xf32> to vector<8x8xbf16>
    %cst_35 = arith.constant dense<0.000000e+00> : vector<8x8xf32>
    %58 = tpu.matmul %57, %41, %cst_35 {dimension_numbers = #tpu.dot_dimension_numbers<[1], [0], [0], [1], [0, 0, 1, 1], [], []>} : vector<8x8xbf16>, vector<8x8xbf16>, vector<8x8xf32> -> vector<8x8xf32>
    %59 = vector.broadcast %7 : vector<8x1xf32> to vector<8x8xf32>
    %60 = arith.mulf %58, %59 : vector<8x8xf32>
    %c0_36 = arith.constant 0 : index
    %c0_37 = arith.constant 0 : index
    %c8_38 = arith.constant 8 : index
    %61 = vector.load %arg7[%c0_36, %c0_37, %c8_38] : memref<1x8x32xf32, #tpu.memory_space<vmem>>, vector<1x8x8xf32>
    %62 = vector.shape_cast %61 : vector<1x8x8xf32> to vector<8x8xf32>
    %63 = vector.shape_cast %60 : vector<8x8xf32> to vector<1x8x8xf32>
    tpu.vector_store %arg7[%c0_36, %c0_37, %c8_38], %63 {strides = array<i32>} : memref<1x8x32xf32, #tpu.memory_space<vmem>>, vector<1x8x8xf32>,
    %c0_39 = arith.constant 0 : index
    %c0_40 = arith.constant 0 : index
    %c16 = arith.constant 16 : index
    %64 = vector.load %arg2[%c0_39, %c0_40, %c16] : memref<1x8x32xbf16, #tpu.memory_space<vmem>>, vector<1x8x8xbf16>
    %65 = vector.shape_cast %64 : vector<1x8x8xbf16> to vector<8x8xbf16>
    %c0_41 = arith.constant 0 : index
    %c0_42 = arith.constant 0 : index
    %c16_43 = arith.constant 16 : index
    %66 = vector.load %arg3[%c0_41, %c0_42, %c16_43] : memref<1x8x32xbf16, #tpu.memory_space<vmem>>, vector<1x8x8xbf16>
    %67 = vector.shape_cast %66 : vector<1x8x8xbf16> to vector<8x8xbf16>
    %c0_44 = arith.constant 0 : index
    %c0_45 = arith.constant 0 : index
    %c16_46 = arith.constant 16 : index
    %68 = vector.load %arg4[%c0_44, %c0_45, %c16_46] : memref<1x8x32xbf16, #tpu.memory_space<vmem>>, vector<1x8x8xbf16>
    %69 = vector.shape_cast %68 : vector<1x8x8xbf16> to vector<8x8xbf16>
    %cst_47 = arith.constant dense<0.000000e+00> : vector<8x8xf32>
    %70 = tpu.matmul %65, %67, %cst_47 {dimension_numbers = #tpu.dot_dimension_numbers<[1], [1], [0], [0], [0, 0, 1, 0], [], []>} : vector<8x8xbf16>, vector<8x8xbf16>, vector<8x8xf32> -> vector<8x8xf32>
    %cst_48 = arith.constant 0.353553385 : f32
    %71 = vector.broadcast %cst_48 : f32 to vector<8x8xf32>
    %72 = arith.mulf %70, %71 : vector<8x8xf32>
    %73 = vector.broadcast %5 : vector<1x8xf32> to vector<8x8xf32>
    %74 = arith.subf %72, %73 : vector<8x8xf32>
    %cst_49 = arith.constant dense<0xFF800000> : vector<8xf32>
    %75 = vector.multi_reduction <maximumf>, %74, %cst_49 [1] : vector<8x8xf32> to vector<8xf32>
    %76 = vector.shape_cast %75 : vector<8xf32> to vector<8x1xf32>
    %77 = vector.broadcast %76 : vector<8x1xf32> to vector<8x8xf32>
    %78 = arith.subf %74, %77 : vector<8x8xf32>
    %79 = math.exp %78 : vector<8x8xf32>
    %cst_50 = arith.constant dense<0.000000e+00> : vector<8xf32>
    %80 = vector.multi_reduction <add>, %79, %cst_50 [1] : vector<8x8xf32> to vector<8xf32>
    %81 = vector.shape_cast %80 : vector<8xf32> to vector<8x1xf32>
    %82 = tpu.reciprocal %81 {approx = true} : vector<8x1xf32> -> vector<8x1xf32>
    %83 = vector.broadcast %82 : vector<8x1xf32> to vector<8x8xf32>
    %84 = arith.mulf %79, %83 : vector<8x8xf32>
    %85 = arith.truncf %84 : vector<8x8xf32> to vector<8x8xbf16>
    %cst_51 = arith.constant dense<0.000000e+00> : vector<8x8xf32>
    %86 = tpu.matmul %85, %69, %cst_51 {dimension_numbers = #tpu.dot_dimension_numbers<[1], [0], [0], [1], [0, 0, 1, 1], [], []>} : vector<8x8xbf16>, vector<8x8xbf16>, vector<8x8xf32> -> vector<8x8xf32>
    %87 = vector.broadcast %7 : vector<8x1xf32> to vector<8x8xf32>
    %88 = arith.mulf %86, %87 : vector<8x8xf32>
    %c0_52 = arith.constant 0 : index
    %c0_53 = arith.constant 0 : index
    %c16_54 = arith.constant 16 : index
    %89 = vector.load %arg7[%c0_52, %c0_53, %c16_54] : memref<1x8x32xf32, #tpu.memory_space<vmem>>, vector<1x8x8xf32>
    %90 = vector.shape_cast %89 : vector<1x8x8xf32> to vector<8x8xf32>
    %91 = vector.shape_cast %88 : vector<8x8xf32> to vector<1x8x8xf32>
    tpu.vector_store %arg7[%c0_52, %c0_53, %c16_54], %91 {strides = array<i32>} : memref<1x8x32xf32, #tpu.memory_space<vmem>>, vector<1x8x8xf32>,
    %c0_55 = arith.constant 0 : index
    %c0_56 = arith.constant 0 : index
    %c24 = arith.constant 24 : index
    %92 = vector.load %arg2[%c0_55, %c0_56, %c24] : memref<1x8x32xbf16, #tpu.memory_space<vmem>>, vector<1x8x8xbf16>
    %93 = vector.shape_cast %92 : vector<1x8x8xbf16> to vector<8x8xbf16>
    %c0_57 = arith.constant 0 : index
    %c0_58 = arith.constant 0 : index
    %c24_59 = arith.constant 24 : index
    %94 = vector.load %arg3[%c0_57, %c0_58, %c24_59] : memref<1x8x32xbf16, #tpu.memory_space<vmem>>, vector<1x8x8xbf16>
    %95 = vector.shape_cast %94 : vector<1x8x8xbf16> to vector<8x8xbf16>
    %c0_60 = arith.constant 0 : index
    %c0_61 = arith.constant 0 : index
    %c24_62 = arith.constant 24 : index
    %96 = vector.load %arg4[%c0_60, %c0_61, %c24_62] : memref<1x8x32xbf16, #tpu.memory_space<vmem>>, vector<1x8x8xbf16>
    %97 = vector.shape_cast %96 : vector<1x8x8xbf16> to vector<8x8xbf16>
    %cst_63 = arith.constant dense<0.000000e+00> : vector<8x8xf32>
    %98 = tpu.matmul %93, %95, %cst_63 {dimension_numbers = #tpu.dot_dimension_numbers<[1], [1], [0], [0], [0, 0, 1, 0], [], []>} : vector<8x8xbf16>, vector<8x8xbf16>, vector<8x8xf32> -> vector<8x8xf32>
    %cst_64 = arith.constant 0.353553385 : f32
    %99 = vector.broadcast %cst_64 : f32 to vector<8x8xf32>
    %100 = arith.mulf %98, %99 : vector<8x8xf32>
    %101 = vector.broadcast %5 : vector<1x8xf32> to vector<8x8xf32>
    %102 = arith.subf %100, %101 : vector<8x8xf32>
    %cst_65 = arith.constant dense<0xFF800000> : vector<8xf32>
    %103 = vector.multi_reduction <maximumf>, %102, %cst_65 [1] : vector<8x8xf32> to vector<8xf32>
    %104 = vector.shape_cast %103 : vector<8xf32> to vector<8x1xf32>
    %105 = vector.broadcast %104 : vector<8x1xf32> to vector<8x8xf32>
    %106 = arith.subf %102, %105 : vector<8x8xf32>
    %107 = math.exp %106 : vector<8x8xf32>
    %cst_66 = arith.constant dense<0.000000e+00> : vector<8xf32>
    %108 = vector.multi_reduction <add>, %107, %cst_66 [1] : vector<8x8xf32> to vector<8xf32>
    %109 = vector.shape_cast %108 : vector<8xf32> to vector<8x1xf32>
    %110 = tpu.reciprocal %109 {approx = true} : vector<8x1xf32> -> vector<8x1xf32>
    %111 = vector.broadcast %110 : vector<8x1xf32> to vector<8x8xf32>
    %112 = arith.mulf %107, %111 : vector<8x8xf32>
    %113 = arith.truncf %112 : vector<8x8xf32> to vector<8x8xbf16>
    %cst_67 = arith.constant dense<0.000000e+00> : vector<8x8xf32>
    %114 = tpu.matmul %113, %97, %cst_67 {dimension_numbers = #tpu.dot_dimension_numbers<[1], [0], [0], [1], [0, 0, 1, 1], [], []>} : vector<8x8xbf16>, vector<8x8xbf16>, vector<8x8xf32> -> vector<8x8xf32>
    %115 = vector.broadcast %7 : vector<8x1xf32> to vector<8x8xf32>
    %116 = arith.mulf %114, %115 : vector<8x8xf32>
    %c0_68 = arith.constant 0 : index
    %c0_69 = arith.constant 0 : index
    %c24_70 = arith.constant 24 : index
    %117 = vector.load %arg7[%c0_68, %c0_69, %c24_70] : memref<1x8x32xf32, #tpu.memory_space<vmem>>, vector<1x8x8xf32>
    %118 = vector.shape_cast %117 : vector<1x8x8xf32> to vector<8x8xf32>
    %119 = vector.shape_cast %116 : vector<8x8xf32> to vector<1x8x8xf32>
    tpu.vector_store %arg7[%c0_68, %c0_69, %c24_70], %119 {strides = array<i32>} : memref<1x8x32xf32, #tpu.memory_space<vmem>>, vector<1x8x8xf32>,
    return
  }
  func.func @transform_0(%arg0: i32, %arg1: i32) -> (i32, i32, i32) {
    %c0_i32 = arith.constant 0 : i32
    %c0_i32_0 = arith.constant 0 : i32
    return %arg0, %arg1, %c0_i32 : i32, i32, i32
  }
  func.func @transform_1(%arg0: i32, %arg1: i32) -> (i32, i32, i32) {
    %c0_i32 = arith.constant 0 : i32
    %c0_i32_0 = arith.constant 0 : i32
    %c0_i32_1 = arith.constant 0 : i32
    return %arg0, %c0_i32, %c0_i32_0 : i32, i32, i32
  }
  func.func @transform_2(%arg0: i32, %arg1: i32) -> (i32, i32, i32) {
    %c0_i32 = arith.constant 0 : i32
    %c0_i32_0 = arith.constant 0 : i32
    %c0_i32_1 = arith.constant 0 : i32
    return %arg0, %c0_i32, %c0_i32_0 : i32, i32, i32
  }
  func.func @transform_3(%arg0: i32, %arg1: i32) -> (i32, i32, i32) {
    %c0_i32 = arith.constant 0 : i32
    %c0_i32_0 = arith.constant 0 : i32
    %c0_i32_1 = arith.constant 0 : i32
    return %arg0, %c0_i32, %c0_i32_0 : i32, i32, i32
  }
  func.func @transform_4(%arg0: i32, %arg1: i32) -> (i32, i32, i32) {
    %c0_i32 = arith.constant 0 : i32
    %c0_i32_0 = arith.constant 0 : i32
    return %arg0, %arg1, %c0_i32 : i32, i32, i32
  }
  func.func @transform_5(%arg0: i32, %arg1: i32) -> (i32, i32, i32) {
    %c0_i32 = arith.constant 0 : i32
    %c0_i32_0 = arith.constant 0 : i32
    return %arg0, %arg1, %c0_i32 : i32, i32, i32
  }
}

</mosaic_0001>

<bundles_post_ra>
// kernel: mha_forward.2
= control target key start
LH: loop header
LB: loop body
LE: loop exit
PB: predicated region body
PF: predicated region fallthrough
CT: control target
= control target key end

     0   :  { %v375_v0 = vmov 0.0   ;;  %vm376_vm0 = vmmov 0   ;;  %vm54_vm1 = vcmask 261120   ;;  %vm107_vm2 = vcmask 257024   ;;  %s480_s3 = inlined_call_operand.vmem [shape: bf16[3,32,32], index: 3, kind: input, shape index: {}]   ;;  %s481_s0 = inlined_call_operand.vmem [shape: bf16[16,32], index: 0, kind: input, shape index: {}]   ;;  %s482_s1 = inlined_call_operand.vmem [shape: bf16[16,32], index: 1, kind: input, shape index: {}]   ;;  %s483_s2 = inlined_call_operand.vmem [shape: bf16[16,32], index: 2, kind: input, shape index: {}]   ;;  %s484_s4 = inlined_call_operand.vmem [shape: f32[3,1,32], index: 4, kind: input, shape index: {}]   ;;  %s485_s5 = inlined_call_operand.vmem [shape: bf16[16,32], index: 5, kind: output, shape index: {0}]   ;;  %s486_s6 = inlined_call_operand.vmem [shape: bf16[16,32], index: 6, kind: output, shape index: {1}]   ;;  %s487_s7 = inlined_call_operand.vmem [shape: bf16[16,32], index: 7, kind: output, shape index: {2}]  }
   0x1   :  { %340 = vmatprep.subr.bf16.mxu0 %v375_v0  ;;  %v366_v1 = vld [vmem:[%s480_s3] sm:$0xff]   ;;  %348 = vmatprep.subr.bf16.mxu1 %v375_v0  ;;  %v367_v2 = vld [vmem:[%s480_s3 + $0x8] sm:$0xff]   ;;  %v368_v3 = vld [vmem:[%s480_s3 + $0x10] sm:$0xff]  }
   0x2   :  { %344 = vmatprep.mubr.msk.bf16.mxu0 %vm376_vm0, %v375_v0  ;;  %352 = vmatprep.mubr.msk.bf16.mxu1 %vm376_vm0, %v375_v0  ;;  %v369_v4 = vld [vmem:[%s481_s0] sm:$0xff]   ;;  %v371_v5 = vld [vmem:[%s480_s3 + $0x18] sm:$0xff]   ;;  %v372_v8 = vld [vmem:[%s480_s3 + $0x28] sm:$0xff]  }
   0x3   :  { %341 = vmatpush3.bf16.msra.mxu0 %v366_v1  ;;  %349 = vmatpush3.bf16.msra.mxu1 %v368_v3  ;;  %v370_v6 = vld [vmem:[%s480_s3 + $0x20] sm:$0xff]  }
   0x4   :  { %342 = vmatprep.subr.bf16.mxu0 %v375_v0  ;;  %350 = vmatprep.subr.bf16.mxu1 %v375_v0  ;;  %v373_v7 = vld [vmem:[%s482_s1] sm:$0xff]  }
   0x5   :  { %v374_v9 = vld [vmem:[%s483_s2] sm:$0xff]  }
   0x6   :  { %v294_v10 = vld [vmem:[%s484_s4] ss:$0 sm:$0xff]  ;;  %v306_v12 = vld [vmem:[%s484_s4 + $0x1] ss:$0 sm:$0xff]  ;;  %v318_v27 = vld [vmem:[%s484_s4 + $0x2] ss:$0 sm:$0xff] }
   0x7   :  { %343 = vmatpush3.bf16.msra.mxu0 %v367_v2  ;;  %351 = vmatpush3.bf16.msra.mxu1 %v371_v5 }
   0x8   :  { %356 = vmatprep.subr.bf16.mxu0 %v375_v0 }
   0xa   :  { %345 = vmatmul.mubr.msk.bf16.vlgmr.msra.gmra.mrb[0].mxu0 %vm54_vm1, %v369_v4  ;;  %353 = vmatmul.mubr.msk.bf16.vlgmr.msra.gmra.mrb[0].mxu1 %vm54_vm1, %v373_v7 }
   0xb   :  { %357 = vmatpush3.bf16.msra.mxu0 %v370_v6  ;;  %360 = vmatprep.mubr.msk.bf16.mxu0 %vm376_vm0, %v375_v0 }
   0xc   :  { %358 = vmatprep.subr.bf16.mxu0 %v375_v0 }
   0xf   :  { %359 = vmatpush3.bf16.msra.mxu0 %v372_v8 }
  0x12   :  { %361 = vmatmul.mubr.msk.bf16.vlgmr.msra.gmra.mrb[4].mxu0 %vm54_vm1, %v374_v9 }
  0xdd   :  { %v92_v11 = vpop.f32.mrb[0].mxu0  ;;  %v179_v16 = vpop.f32.mrb[0].mxu1 }
  0xde   :  { %v93_v13 = vadd.f32 %v294_v10, %v92_v11  ;;  %v346_v14 = vpop.f32.mrb[1].mxu0  ;;  %v180_v20 = vadd.f32 %v306_v12, %v179_v16  ;;  %v354_v21 = vpop.f32.mrb[1].mxu1 }
  0xdf   :  { %v95_v15 = vpop.f32.mrb[2].mxu0  ;;  %v182_v22 = vpop.f32.mrb[2].mxu1 }
  0xe0   :  { %v325_v17 = vpack.c.bf16 %v93_v13, %v93_v13  ;;  %v96_v18 = vadd.f32 %v294_v10, %v95_v15  ;;  %v347_v19 = vpop.f32.mrb[3].mxu0  ;;  %v327_v24 = vpack.c.bf16 %v180_v20, %v180_v20  ;;  %v183_v25 = vadd.f32 %v306_v12, %v182_v22  ;;  %v355_v26 = vpop.f32.mrb[3].mxu1 }
  0xe2   :  { %108 = vst.msk [vmem:[%s485_s5] sm:$0xf] %vm107_vm2, %v325_v17  ;;  %v326_v23 = vpack.c.bf16 %v96_v18, %v96_v18  ;;  %194 = vst.msk [vmem:[%s486_s6] sm:$0xf] %vm107_vm2, %v327_v24  ;;  %v328_v28 = vpack.c.bf16 %v183_v25, %v183_v25 }
  0xe4   :  { %109 = vst.msk [vmem:[%s485_s5 + $0x4] sm:$0xf] %vm107_vm2, %v326_v23  ;;  %195 = vst.msk [vmem:[%s486_s6 + $0x4] sm:$0xf] %vm107_vm2, %v328_v28 }
  0xe5   :  { %v265_v29 = vpop.f32.mrb[4].mxu0 }
  0xe6   :  { %v266_v30 = vadd.f32 %v318_v27, %v265_v29  ;;  %v362_v31 = vpop.f32.mrb[5].mxu0 }
  0xe7   :  { %v268_v32 = vpop.f32.mrb[6].mxu0 }
  0xe8   :  { %v329_v33 = vpack.c.bf16 %v266_v30, %v266_v30  ;;  %v269_v34 = vadd.f32 %v318_v27, %v268_v32  ;;  %v363_v35 = vpop.f32.mrb[7].mxu0 }
  0xea   :  { %280 = vst.msk [vmem:[%s487_s7] sm:$0xf] %vm107_vm2, %v329_v33  ;;  %v330_v36 = vpack.c.bf16 %v269_v34, %v269_v34 }
  0xec   :  { %281 = vst.msk [vmem:[%s487_s7 + $0x4] sm:$0xf] %vm107_vm2, %v330_v36 }

// kernel: mha_forward.3
= control target key start
LH: loop header
LB: loop body
LE: loop exit
PB: predicated region body
PF: predicated region fallthrough
CT: control target
= control target key end

     0   :  { %10 = vsyncpa [#allocation3], 0  ;;  %s1512_s0 = inlined_call_operand.vmem [shape: bf16[2,8,32], index: 0, kind: input, shape index: {}]   ;;  %s1513_s1 = inlined_call_operand.vmem [shape: bf16[2,8,32], index: 1, kind: input, shape index: {}]   ;;  %s1514_s2 = inlined_call_operand.vmem [shape: bf16[2,8,32], index: 2, kind: input, shape index: {}]   ;;  %s1515_s3 = inlined_call_operand.vmem [shape: f32[2,1,8], index: 3, kind: input, shape index: {}]   ;;  %s1516_s4 = inlined_call_operand.vmem [shape: f32[2,8,1], index: 4, kind: input, shape index: {}]   ;;  %s1517_s5 = inlined_call_operand.hbm [shape: f32[2,8,32], index: 5, kind: output, shape index: {}]  }
   0x1   :  { %12 = vsyncpa [#allocation3 + $0x1], 0  ;;  %s1282_s18 = smov 0   ;;  %s1284_s19 = smov 0  }
   0x2   :  { %s1286_s20 = smov 0   ;;  %s1288_s21 = smov 0  }
   0x3   :  { %s1290_s22 = smov 0   ;;  %s1292_s23 = smov 0  }
   0x4 LB: > { %s977_s24 = sadd.s32 4294967295, %s1240_s23   ;;  %s978_s25 = sadd.s32 4294967294, %s1240_s23   ;;  %s1240_s23 = sphi %s1292_s23, %s18_s23   ;;  %s1236_s22 = sphi %s1290_s22, %s1524_s22   ;;  %s1232_s21 = sphi %s1288_s21, %s1523_s21   ;;  %s1228_s20 = sphi %s1286_s20, %s1522_s20   ;;  %s1224_s19 = sphi %s1284_s19, %s1521_s19   ;;  %s1220_s18 = sphi %s1282_s18, %s1520_s18  }
   0x5   : > { %s30_s26 = sadd.s32 1, %s1236_s22  ;;  %s173_s27 = sadd.s32 1, %s1228_s20 }
   0x6   : > { %p32_p0 = scmp.ge.s32.totalorder %s30_s26, 2  ;;  %p183_p1 = scmp.ne.s32.totalorder %s1228_s20, %s1224_s19 }
   0x7   : > { %p184_p2 = scmp.eq.s32.totalorder %s977_s24, 1  ;;  %p189_p3 = scmp.ne.s32.totalorder %s1224_s19, %s1220_s18 }
   0x8   : > { %s1526_s26 = smov (%p32_p0, %s30_s26), 0  ;;  %p190_p5 = scmp.eq.s32.totalorder %s978_s25, 1 }
   0x9   : > { %p1322_p4 = por %p184_p2, %p183_p1  ;;  %s168_s29 = ssub.s32 %s1236_s22, %s1526_s26 }
   0xa   : > { %p981_p6 = scmp.ge.s32.totalorder %s1240_s23, 1  ;;  %p171_p7 = scmp.eq.s32.totalorder %s168_s29, 0 }
   0xb   : > { %p1329_p8 = por %p190_p5, %p189_p3  ;;  %p248_p9 = scmp.lt.s32.totalorder %s1240_s23, 3 }
   0xc   : > { %s1335_s6 = scalar_select %p171_p7, %s1228_s20, %s173_s27  }
   0xd   : > { %p249_p10 = pnand %p981_p6, %p248_p9 }
   0xe   : > { %p296_p11 = scmp.lt.s32.totalorder (!%p249_p10), %s1232_s21, 1  ;;  %v1242_v0 = vmov (!%p249_p10), 0.0   ;;  %vm1243_vm0 = vmmov (!%p249_p10), 0   ;;  %vm329_vm1 = vcmask (!%p249_p10), 64512   ;;  %v378_v4 = vlaneseq (!%p249_p10)  ;;  %s1244_s24 = smov (!%p249_p10), 120  }
   0xf   : > { %252 = sbr.rel (%p249_p10) target bundleno = 1503 (0x5df), region = 40  ;;  %1024 = vmatprep.subr.bf16.mxu0 (!%p249_p10), %v1242_v0  ;;  %1026 = vmatprep.mubr.msk.bf16.mxu0 (!%p249_p10), %vm1243_vm0, %v1242_v0  ;;  %s1245_s25 = smov (!%p249_p10), 112   ;;  %vm399_vm2 = vcmask (!%p249_p10), 1043456   ;;  %vm579_vm3 = vcmask (!%p249_p10), 130112   ;;  %vm710_vm4 = vcmask (!%p249_p10), 195712   ;;  %vm841_vm5 = vcmask (!%p249_p10), 261312  }
  0x10   : > { %1030 = vmatprep.subr.bf16.mxu1 (!%p249_p10), %v1242_v0  ;;  %1032 = vmatprep.mubr.msk.bf16.mxu1 (!%p249_p10), %vm1243_vm0, %v1242_v0  ;;  %v379_v7 = vshrl.u32 (!%p249_p10), %v378_v4, 7  ;;  %s1246_s27 = smov (!%p249_p10), 104   ;;  %s1248_s16 = smov (!%p249_p10), 8  }
  0x12   : > { %v380_v9 = vsub.s32 (!%p249_p10), 0, %v379_v7 }
  0x16   : > { %s1342_s7 = scalar_select %p296_p11, %s1232_s21, 1 }
  0x18   : > { %s1348_s8 = sshll.u32 %s1342_s7, 2  ;;  %s313_s17 = scalar_lea.vmem %s1515_s3, %s1342_s7 }
  0x19   : > { %s1354_s11 = scalar_lea.vmem %s1513_s1, %s1348_s8  ;;  %s1361_s14 = scalar_lea.vmem %s1512_s0, %s1348_s8  ;;  %v322_v5 = vld [vmem:[%s313_s17] sm:$0x1] }
  0x1a   : > { %v327_v1 = vld [vmem:[%s1354_s11] sm:$0xf]  ;;  %v323_v6 = vsub.f32 1.0, %v322_v5  ;;  %s1392_s10 = scalar_lea.vmem %s1514_s2, %s1348_s8  ;;  %s986_s8 = sshll.u32 %s1342_s7, 3 }
  0x1b   : > { %v334_v2 = vsel %vm329_vm1, %v327_v1, 0  ;;  %v326_v3 = vld [vmem:[%s1361_s14] sm:$0xf]  ;;  %s320_s13 = scalar_lea.vmem %s1516_s4, %s986_s8  ;;  %s293_s7 = sand.u32 1, %s1224_s19  }
  0x1c   : > { %1025 = vmatpush3.bf16.xpose.msra.mxu0 %v334_v2  ;;  %v324_v8 = vmul.f32 1e+10, %v323_v6  ;;  %v1137_v18 = vld [vmem:[%s1354_s11] ss:$0 sps:$4 sm:$0xff]   ;;  %v1247_v6 = vmov 0   ;;  %s1249_s17 = smov 16  }
  0x1d   : > { %1042 = vmatprep.subr.bf16.mxu0 %v1242_v0  ;;  %461 = vrot.lane.b32.xlu1 %v1137_v18, %s1244_s24  ;;  %v1138_v19 = vld [vmem:[%s1361_s14] ss:$0 sps:$4 sm:$0xff]   ;;  %s844_s8 = scalar_lea.sflag [#allocation3], %s293_s7 }
  0x1e   : > { %v1373_v10 = vrot.slane %v324_v8, %v380_v9  ;;  %v1140_v20 = vld [vmem:[%s1361_s14] ss:$0 sps:$4 sm:$0xff]   ;;  %1136 = vset.pattern.permute.xlu0 %v1247_v6 }
  0x1f   : > { %v1141_v21 = vld [vmem:[%s1354_s11] ss:$0 sps:$4 sm:$0xff]  }
  0x20   : > { %v1142_v22 = vld [vmem:[%s1361_s14] ss:$0 sps:$4 sm:$0xff]   ;;  %s982_s14 = sshll.u32 %s293_s7, 3 }
  0x21   : > { %456 = vrot.lane.b32.xlu1 %v1138_v19, %s1244_s24  ;;  %v328_v28 = vld [vmem:[%s1392_s10] sm:$0xf]  ;;  %s1446_s15 = scalar_lea.vmem [#allocation2], %s982_s14 }
  0x22   : > { %v401_v29 = vsel %vm399_vm2, %v328_v28, 0  ;;  %v1139_v30 = vld [vmem:[%s1354_s11] ss:$0 sps:$4 sm:$0xff]  }
  0x23   : > { %1027 = vmatmul.mubr.msk.bf16.vlgmr.msra.gmra.mrb[0].mxu0 %vm329_vm1, %v326_v3  ;;  %1031 = vmatpush3.bf16.msra.mxu1 %v401_v29  ;;  %v1144_v18 = vld [vmem:[%s1392_s10] ss:$0 sps:$4 sm:$0xff]  }
  0x24   : > { %1044 = vmatprep.mubr.msk.bf16.mxu0 %vm1243_vm0, %v1242_v0  ;;  %1036 = vmatprep.subr.bf16.mxu1 %v1242_v0 }
  0x25   : > { %587 = vrot.lane.b32.xlu1 %v1140_v20, %s1245_s25 }
  0x29   : > { %723 = vrot.lane.b32.xlu1 %v1141_v21, %s1246_s27  ;;  %v325_v21 = vld [vmem:[%s320_s13] sm:$0xff] }
  0x2d   : > { %718 = vrot.lane.b32.xlu1 %v1142_v22, %s1246_s27 }
  0x8f   : > { %v462_v33 = vpop.permute.xlu1 %461 }
  0x90   : > { %v467_v35 = vsel %vm329_vm1, %v462_v33, 0 }
  0x93   : > { %v457_v37 = vpop.permute.xlu1 %456 }
  0x97   : > { %v588_v39 = vpop.permute.xlu1 %587 }
  0x9b   : > { %v724_v41 = vpop.permute.xlu1 %723 }
  0x9c   : > { %v729_v42 = vsel %vm329_vm1, %v724_v41, 0 }
  0x9f   : > { %v719_v43 = vpop.permute.xlu1 %718 }
  0xf6   : > { %v370_v11 = vpop.f32.mrb[0].mxu0 }
  0xf7   : > { %v376_v12 = vmul.f32 0.35355338, %v370_v11  ;;  %v1028_v13 = vpop.f32.mrb[1].mxu0 }
  0xf8   : > { %v373_v14 = vpop.f32.mrb[2].mxu0 }
  0xf9   : > { %v1029_v15 = vpop.f32.mrb[3].mxu0  ;;  %v383_v16 = vsub.f32 %v376_v12, %v1373_v10 }
  0xfb   : > { %v384_v17 = vsel %vm329_vm1, %v383_v16, -inf }
  0xfc   : > { %385 = vmax.xlane.f32.xlu0 %v384_v17  ;;  %v1143_v17 = vld [vmem:[%s1392_s10] ss:$0 sps:$4 sm:$0xff]  }
 0x189   : > { %v386_v23 = vpop.xlane.xlu0 %385 }
 0x18a   : > { %v387_v24 = vsub.f32 %v383_v16, %v386_v23 }
 0x18c   : > { %v388_v25 = vmul.f32 1.442695, %v387_v24 }
 0x18e   : > { %1146 = vpow2.f32 %v388_v25  ;;  %v1145_v25 = vld [vmem:[%s1392_s10] ss:$0 sps:$4 sm:$0xff]  }
 0x198   : > { %v1147_v26 = vpop.eup %1146 }
 0x199   : > { %v390_v27 = vsel %vm329_vm1, %v1147_v26, 0.0 }
 0x19a   : > { %391 = vadd.xlane.f32.xlu0 %v390_v27 }
 0x1b0   : > { %592 = vrot.lane.b32.xlu0 %v1139_v30, %s1245_s25 }
 0x227   : > { %v392_v31 = vpop.xlane.xlu0 %391 }
 0x228   : > { %1148 = vrcp.f32 %v392_v31 }
 0x22b   : > { %v593_v38 = vpop.permute.xlu0 %592 }
 0x22c   : > { %v598_v40 = vsel %vm329_vm1, %v593_v38, 0 }
 0x232   : > { %v1149_v32 = vpop.eup %1148 }
 0x233   : > { %v394_v34 = vmul.f32 %v1149_v32, %v1147_v26 }
 0x235   : > { %v395_v36 = vpack.c.bf16 %v394_v34, %v394_v34 }
 0x237   : > { %1033 = vmatmul.mubr.msk.bf16.vlgmr.msra.gmra.mrb[0].mxu1 %vm329_vm1, %v395_v36 }
 0x238   : > { %1037 = vmatpush3.bf16.xpose.msra.mxu1 %v467_v35  ;;  %1038 = vmatprep.mubr.msk.bf16.mxu1 %vm1243_vm0, %v1242_v0 }
 0x239   : > { %1048 = vmatprep.subr.bf16.mxu1 %v1242_v0 }
 0x23f   : > { %1039 = vmatmul.mubr.msk.bf16.vlgmr.msra.gmra.mrb[4].mxu1 %vm329_vm1, %v457_v37 }
 0x240   : > { %1049 = vmatpush3.bf16.xpose.msra.mxu1 %v598_v40  ;;  %1050 = vmatprep.mubr.msk.bf16.mxu1 %vm1243_vm0, %v1242_v0 }
 0x241   : > { %1060 = vmatprep.subr.bf16.mxu1 %v1242_v0 }
 0x247   : > { %1051 = vmatmul.mubr.msk.bf16.vlgmr.msra.gmra.mrb[8].mxu1 %vm329_vm1, %v588_v39 }
 0x248   : > { %1061 = vmatpush3.bf16.xpose.msra.mxu1 %v729_v42  ;;  %1062 = vmatprep.mubr.msk.bf16.mxu1 %vm1243_vm0, %v1242_v0 }
 0x24f   : > { %1063 = vmatmul.mubr.msk.bf16.vlgmr.msra.gmra.mrb[12].mxu1 %vm329_vm1, %v719_v43 }
 0x30a   : > { %v1414_v44 = vpop.f32.mrb[0].mxu1 }
 0x30b   : > { %v1034_v45 = vpop.f32.mrb[1].mxu1 }
 0x30c   : > { %v440_v46 = vpop.f32.mrb[2].mxu1 }
 0x30d   : > { %v1035_v47 = vpop.f32.mrb[3].mxu1 }
 0x312   : > { %v503_v48 = vpop.f32.mrb[4].mxu1 }
 0x313   : > { %v509_v49 = vmul.f32 0.35355338, %v503_v48  ;;  %v1040_v50 = vpop.f32.mrb[5].mxu1 }
 0x314   : > { %v506_v51 = vpop.f32.mrb[6].mxu1 }
 0x315   : > { %v1041_v52 = vpop.f32.mrb[7].mxu1  ;;  %v510_v53 = vsub.f32 %v509_v49, %v1373_v10 }
 0x317   : > { %v511_v54 = vsel %vm329_vm1, %v510_v53, -inf }
 0x318   : > { %512 = vmax.xlane.f32.xlu1 %v511_v54 }
 0x31a   : > { %v634_v55 = vpop.f32.mrb[8].mxu1 }
 0x31b   : > { %v640_v56 = vmul.f32 0.35355338, %v634_v55  ;;  %v1052_v57 = vpop.f32.mrb[9].mxu1 }
 0x31c   : > { %v637_v58 = vpop.f32.mrb[10].mxu1 }
 0x31d   : > { %v641_v59 = vsub.f32 %v640_v56, %v1373_v10  ;;  %v1053_v60 = vpop.f32.mrb[11].mxu1 }
 0x31f   : > { %v642_v61 = vsel %vm329_vm1, %v641_v59, -inf }
 0x320   : > { %643 = vmax.xlane.f32.xlu0 %v642_v61 }
 0x322   : > { %v765_v62 = vpop.f32.mrb[12].mxu1 }
 0x323   : > { %v771_v63 = vmul.f32 0.35355338, %v765_v62  ;;  %v1064_v1 = vpop.f32.mrb[13].mxu1 }
 0x324   : > { %v768_v2 = vpop.f32.mrb[14].mxu1 }
 0x325   : > { %v772_v3 = vsub.f32 %v771_v63, %v1373_v10  ;;  %v1065_v4 = vpop.f32.mrb[15].mxu1 }
 0x327   : > { %v773_v5 = vsel %vm329_vm1, %v772_v3, -inf }
 0x328   : > { %774 = vmax.xlane.f32.xlu1 %v773_v5 }
 0x3a5   : > { %v513_v7 = vpop.xlane.xlu1 %512 }
 0x3a6   : > { %v514_v8 = vsub.f32 %v510_v53, %v513_v7 }
 0x3a8   : > { %v515_v9 = vmul.f32 1.442695, %v514_v8 }
 0x3aa   : > { %1150 = vpow2.f32 %v515_v9 }
 0x3ad   : > { %v644_v11 = vpop.xlane.xlu0 %643 }
 0x3ae   : > { %v645_v12 = vsub.f32 %v641_v59, %v644_v11 }
 0x3b0   : > { %v646_v13 = vmul.f32 1.442695, %v645_v12 }
 0x3b2   : > { %1152 = vpow2.f32 %v646_v13 }
 0x3b4   : > { %v1151_v14 = vpop.eup %1150 }
 0x3b5   : > { %v517_v10 = vsel %vm329_vm1, %v1151_v14, 0.0  ;;  %v775_v19 = vpop.xlane.xlu1 %774 }
 0x3b6   : > { %518 = vadd.xlane.f32.xlu1 %v517_v10  ;;  %v776_v20 = vsub.f32 %v772_v3, %v775_v19 }
 0x3b8   : > { %v777_v22 = vmul.f32 1.442695, %v776_v20 }
 0x3ba   : > { %1154 = vpow2.f32 %v777_v22 }
 0x3bc   : > { %v1153_v15 = vpop.eup %1152 }
 0x3bd   : > { %v648_v16 = vsel %vm329_vm1, %v1153_v15, 0.0 }
 0x3be   : > { %649 = vadd.xlane.f32.xlu0 %v648_v16 }
 0x3c4   : > { %v1155_v23 = vpop.eup %1154 }
 0x3c5   : > { %v779_v24 = vsel %vm329_vm1, %v1155_v23, 0.0 }
 0x3c7   : > { %657 = vrot.lane.b32.xlu1 %v1143_v17, %s1245_s25  ;;  %s1005_s25 = sshll.u32 %s1232_s21, 7  ;;  %s1251_s21 = smov [#allocation2]  }
 0x3c8   : > { %s1462_s10 = scalar_lea.hbm %s1517_s5, %s1005_s25  ;;  %s1166_s12 = sshll.u32 %s1251_s21, 4  ;;  %s1167_s12 = int_to_ptr.vmem [resolvable:$false] %s1166_s12 }
 0x3c9   : > { %s1168_s13 = scalar_lea.vmem %s1167_s12, 256 }
 0x3d4   : > { %526 = vrot.lane.b32.xlu0 %v1144_v18, %s1244_s24  ;;  %s1250_s24 = smov 24  }
 0x3d8   : > { %445 = vperm.xlu0 %1136, %v325_v21  }
 0x3eb   : > { %780 = vadd.xlane.f32.xlu1 %v779_v24 }
 0x3fc   : > { %788 = vrot.lane.b32.xlu1 %v1145_v25, %s1246_s27  ;;  %s858_s27 = sshll.u32 %s1446_s15, 4  ;;  %s1464_s27 = int_to_ptr.vmem [resolvable:$true] %s858_s27 }
 0x3fd   : > { %s1162_s11 = scalar_lea.vmem %s1464_s27, 128  ;;  %p1169_p1 = scmp.lt.s32.totalorder %s1464_s27, %s1167_s12 }
 0x3fe   : > { %p1163_p12 = scmp.ne.s32.totalorder %s1464_s27, %s1162_s11  ;;  %p1170_p2 = scmp.lt.s32.totalorder %s1168_s13, %s1162_s11 }
 0x400   : > { %p1164_p13 = pnand %p1163_p12, %p1322_p4  ;;  %p1171_p3 = por %p1170_p2, %p1169_p1 }
 0x402   : > { %p1165_p0 = pneg %p1164_p13 }
 0x404   : > { %p1172_p5 = pnand %p1171_p3, %p1165_p0 }
 0x443   : > { %v519_v26 = vpop.xlane.xlu1 %518 }
 0x444   : > { %1156 = vrcp.f32 %v519_v26 }
 0x447   : > { %v658_v32 = vpop.permute.xlu1 %657 }
 0x448   : > { %v663_v34 = vsel %vm399_vm2, %v658_v32, 0 }
 0x44b   : > { %v650_v27 = vpop.xlane.xlu0 %649 }
 0x44c   : > { %1158 = vrcp.f32 %v650_v27 }
 0x44e   : > { %v1157_v28 = vpop.eup %1156 }
 0x44f   : > { %v521_v29 = vmul.f32 %v1157_v28, %v1151_v14  ;;  %v527_v30 = vpop.permute.xlu0 %526 }
 0x450   : > { %v532_v31 = vsel %vm399_vm2, %v527_v30, 0 }
 0x451   : > { %1043 = vmatpush3.bf16.msra.mxu0 %v532_v31  ;;  %v522_v33 = vpack.c.bf16 %v521_v29, %v521_v29 }
 0x452   : > { %1054 = vmatprep.subr.bf16.mxu0 %v1242_v0 }
 0x454   : > { %1045 = vmatmul.mubr.msk.bf16.vlgmr.msra.gmra.mrb[4].mxu0 %vm329_vm1, %v522_v33 }
 0x455   : > { %1055 = vmatpush3.bf16.msra.mxu0 %v663_v34  ;;  %1056 = vmatprep.mubr.msk.bf16.mxu0 %vm1243_vm0, %v1242_v0 }
 0x456   : > { %v1159_v35 = vpop.eup %1158  ;;  %1066 = vmatprep.subr.bf16.mxu0 %v1242_v0 }
 0x457   : > { %v652_v36 = vmul.f32 %v1159_v35, %v1153_v15  ;;  %v446_v37 = vpop.permute.xlu0 %445 }
 0x458   : > { %v448_v38 = vmul.f32 %v446_v37, %v1414_v44 }
 0x459   : > { %v653_v39 = vpack.c.bf16 %v652_v36, %v652_v36 }
 0x45a   : > { %449 = vst.msk [vmem:[%s1446_s15] sm:$0xff] %vm329_vm1, %v448_v38 }
 0x45c   : > { %1057 = vmatmul.mubr.msk.bf16.vlgmr.msra.gmra.mrb[8].mxu0 %vm329_vm1, %v653_v39 }
 0x45d   : > { %1068 = vmatprep.mubr.msk.bf16.mxu0 %vm1243_vm0, %v1242_v0 }
 0x478   : > { %v781_v40 = vpop.xlane.xlu1 %780 }
 0x479   : > { %1160 = vrcp.f32 %v781_v40 }
 0x47c   : > { %v789_v41 = vpop.permute.xlu1 %788 }
 0x47d   : > { %v794_v42 = vsel %vm399_vm2, %v789_v41, 0 }
 0x47e   : > { %1067 = vmatpush3.bf16.msra.mxu0 %v794_v42 }
 0x483   : > { %v1161_v43 = vpop.eup %1160 }
 0x484   : > { %v783_v45 = vmul.f32 %v1161_v43, %v1155_v23 }
 0x486   : > { %v784_v44 = vpack.c.bf16 %v783_v45, %v783_v45 }
 0x488   : > { %1069 = vmatmul.mubr.msk.bf16.vlgmr.msra.gmra.mrb[12].mxu0 %vm329_vm1, %v784_v44 }
 0x527   : > { %v568_v46 = vpop.f32.mrb[4].mxu0 }
 0x528   : > { %v574_v47 = vmul.f32 %v568_v46, %v446_v37  ;;  %v1046_v48 = vpop.f32.mrb[5].mxu0 }
 0x529   : > { %v571_v49 = vpop.f32.mrb[6].mxu0 }
 0x52a   : > { %576 = vrot.lane.b32.xlu1 %v574_v47, %s1248_s16  ;;  %v1047_v50 = vpop.f32.mrb[7].mxu0 }
 0x52f   : > { %v699_v51 = vpop.f32.mrb[8].mxu0 }
 0x530   : > { %v705_v0 = vmul.f32 %v699_v51, %v446_v37  ;;  %v1058_v52 = vpop.f32.mrb[9].mxu0 }
 0x531   : > { %v702_v53 = vpop.f32.mrb[10].mxu0 }
 0x532   : > { %707 = vrot.lane.b32.xlu1 %v705_v0, %s1249_s17  ;;  %v1059_v54 = vpop.f32.mrb[11].mxu0 }
 0x55b   : > { %v830_v55 = vpop.f32.mrb[12].mxu0 }
 0x55c   : > { %v836_v56 = vmul.f32 %v830_v55, %v446_v37  ;;  %v1070_v57 = vpop.f32.mrb[13].mxu0 }
 0x55d   : > { %v833_v58 = vpop.f32.mrb[14].mxu0 }
 0x55e   : > { %838 = vrot.lane.b32.xlu0 %v836_v56, %s1250_s24  ;;  %v1071_v59 = vpop.f32.mrb[15].mxu0 }
 0x59c   : > { %v577_v60 = vpop.permute.xlu1 %576 }
 0x59d   : > { %580 = vst.msk [vmem:[%s1446_s15] sm:$0xff] %vm579_vm3, %v577_v60 }
 0x5a4   : > { %v708_v61 = vpop.permute.xlu1 %707 }
 0x5a5   : > { %711 = vst.msk [vmem:[%s1446_s15] sm:$0xff] %vm710_vm4, %v708_v61 }
 0x5d0   : > { %v839_v62 = vpop.permute.xlu0 %838 }
 0x5d1   : > { %842 = vst.msk [vmem:[%s1446_s15] sm:$0xff] %vm841_vm5, %v839_v62 }
 0x5d2   : > { %1175 = shalt.err (!%p1172_p5)
}
 0x5d3   : > { %s1176_s7 = scalar_lea.hbm %s1462_s10, 128  ;;  %s1180_s16 = scalar_lea.hbm %s1517_s5, 256 }
 0x5d4   : > { %p1177_p6 = scmp.ne.s32.totalorder %s1462_s10, %s1176_s7  ;;  %p1181_p10 = scmp.lt.u32.totalorder %s1462_s10, %s1517_s5 }
 0x5d5   : > { %p1182_p11 = scmp.lt.u32.totalorder %s1180_s16, %s1176_s7  ;;  %p1184_p13 = scmp.lt.u32.totalorder %s1176_s7, %s1462_s10 }
 0x5d6   : > { %p1178_p7 = pnand %p1177_p6, %p1322_p4 }
 0x5d7   : > { %p1183_p12 = por %p1182_p11, %p1181_p10 }
 0x5d8   : > { %p1179_p9 = pneg %p1178_p7 }
 0x5d9   : > { %p1185_p0 = por %p1184_p13, %p1183_p12 }
 0x5db   : > { %p1186_p1 = pnand %p1185_p0, %p1179_p9 }
 0x5dd   : > { %1189 = shalt.err (!%p1186_p1)
}
 0x5de   : > { %1072 = dma.vmem_to_hbm [thread:$0]  (%p1322_p4), %s1464_s27, 128, %s1462_s10, %s844_s8  }
 0x5df PF: > { %p1078_p2 = scmp.ge.s32.totalorder %s1240_s23, 2  ;;  %s870_s25 = sand.u32 1, %s1220_s18  }
 0x5e0   : > { %s871_s29 = scalar_lea.sflag [#allocation3], %s870_s25 }
 0x5e1   : > { %p1075_p3 = pnand %p1078_p2, %p1329_p8 }
 0x5e3   : > { %1215 = dma.done.wait (!%p1075_p3), %s871_s29, 128  }
 0x5e4   : > { %1217 = vsyncadd (!%p1075_p3), %s871_s29, 4294967168  ;;  %s18_s23 = sadd.s32 1, %s1240_s23   ;;  %s1520_s18 = smov %s1224_s19 }
 0x5e5   : > { %p15_p5 = scmp.ge.s32.totalorder %s18_s23, 4   ;;  %s1521_s19 = smov %s1228_s20 }
 0x5e6   : > { %s1522_s20 = smov %s1335_s6  ;;  %s1523_s21 = smov %s1236_s22 }
 0x5e7   : > { %s1524_s22 = smov %s1526_s26  ;;  %17 = sbr.rel (!%p15_p5) target bundleno = 4 (0x4), region = 87 }
 0x5ee   :  { %876 = vsyncpa [#allocation3], 1 }
 0x5ef   :  { %878 = vsyncpa [#allocation3 + $0x1], 1 }

</bundles_post_ra>
